<compile_context>
chip_gen: v7x
topology: tpu7x:2x2x1
jax: 0.10.0
libtpu: 0.0.40
codegen_flags: <defaults>
</compile_context>

<pallas_src>
import functools

import jax
import jax.numpy as jnp
from jax.experimental import pallas as pl
from jax.experimental.pallas import tpu as pltpu


_PARAM_ORDER = ("w1", "b1", "w2", "b2", "tw1", "tb1", "tw2", "tb2")


# ---------------------------------------------------------------------------
# Kernels
# ---------------------------------------------------------------------------
def _mlp_scale(avg_pool, max_pool, tab_blk,
               w1, b1, w2, b2, tw1, tb1, tw2, tb2):
    """sigmoid(mlp(avg) + mlp(max) + mlp(tab_embedding)) with the three
    branches summed in hidden space (b2 appears once per branch -> 3*b2)."""
    th = jnp.maximum(
        jnp.dot(tab_blk, tw1, preferred_element_type=jnp.float32) + tb1, 0.0)
    emb = jnp.dot(th, tw2, preferred_element_type=jnp.float32) + tb2

    def hidden(v):
        return jnp.maximum(
            jnp.dot(v, w1, preferred_element_type=jnp.float32) + b1, 0.0)

    h_sum = hidden(avg_pool) + hidden(max_pool) + hidden(emb)
    att = jnp.dot(h_sum, w2, preferred_element_type=jnp.float32) + 3.0 * b2
    return jax.nn.sigmoid(att)


def channel_gate_kernel(hw, x_ref, tab_ref,
                        w1_ref, b1_ref, w2_ref, b2_ref,
                        tw1_ref, tb1_ref, tw2_ref, tb2_ref,
                        out_ref):
    # x_ref: (bt, C, hw) f32    tab_ref: (bt, 1, T) f32
    x = x_ref[...]
    avg_pool = jnp.sum(x, axis=-1) * (1.0 / hw)          # (bt, C)
    max_pool = jnp.max(x, axis=-1)                       # (bt, C)

    scale = _mlp_scale(avg_pool, max_pool, tab_ref[:, 0, :],
                       w1_ref[...], b1_ref[...], w2_ref[...], b2_ref[...],
                       tw1_ref[...], tb1_ref[...], tw2_ref[...], tb2_ref[...])

    # Re-read x for the store: keeps the whole-tile live range short.
    out_ref[...] = (x_ref[...] * scale[:, :, None]).astype(out_ref.dtype)


def pool_mlp_kernel(hw, thw, x_ref, tab_ref,
                    w1_ref, b1_ref, w2_ref, b2_ref,
                    tw1_ref, tb1_ref, tw2_ref, tb2_ref,
                    scale_ref, sum_acc, max_acc):
    # Fallback pass 1: stream HW tiles, accumulate sum/max, emit scale.
    h = pl.program_id(1)

    @pl.when(h == 0)
    def _():
        sum_acc[...] = jnp.zeros_like(sum_acc)
        max_acc[...] = jnp.full_like(max_acc, -jnp.inf)

    x = x_ref[...]                                       # (1, C, thw)
    if hw % thw != 0:
        # Edge HW tile: out-of-bounds lanes hold unspecified data -> mask.
        lane = jax.lax.broadcasted_iota(jnp.int32, x.shape, 2)
        valid = (h * thw + lane) < hw
        x_sum = jnp.where(valid, x, 0.0)
        x_max = jnp.where(valid, x, -jnp.inf)
    else:
        x_sum, x_max = x, x
    sum_acc[...] = sum_acc[...] + jnp.sum(x_sum, axis=-1)
    max_acc[...] = jnp.maximum(max_acc[...], jnp.max(x_max, axis=-1))

    @pl.when(h == pl.num_programs(1) - 1)
    def _():
        scale = _mlp_scale(
            sum_acc[...] * (1.0 / hw), max_acc[...], tab_ref[:, 0, :],
            w1_ref[...], b1_ref[...], w2_ref[...], b2_ref[...],
            tw1_ref[...], tb1_ref[...], tw2_ref[...], tb2_ref[...])
        scale_ref[...] = scale[:, None, :]


def scale_mul_kernel(x_ref, scale_ref, out_ref):
    # Fallback pass 2: out = x * scale, independently tiled over (B, HW).
    out_ref[...] = (x_ref[...]
                    * scale_ref[:, 0, :][:, :, None]).astype(out_ref.dtype)


# ---------------------------------------------------------------------------
# Wrapper
# ---------------------------------------------------------------------------
def _vmem_budget_bytes():
    try:
        cap = int(pltpu.get_tpu_info().vmem_capacity_bytes)
    except Exception:
        cap = 64 * 1024 * 1024            # conservative (v7x per-TC VMEM)
    return int(cap * 0.85)


def _pick_block_b(B, sample_bytes, overhead_bytes, budget, target_hi=4 << 20):
    """Largest divisor of B giving a <=4 MiB block that fits the VMEM budget,
    while keeping grid length >= 2 (so v7x's two TensorCores both get work)."""
    best = 1
    for d in range(1, B + 1):
        if B % d != 0:
            continue
        block_bytes = d * sample_bytes
        if 4 * block_bytes + overhead_bytes > budget:
            continue
        if d > 1 and block_bytes > target_hi:
            continue
        if B > 1 and B // d < 2:
            continue
        best = max(best, d)
    return best


def _resident_spec(arr, grid_rank):
    nd = arr.ndim
    if grid_rank == 1:
        return pl.BlockSpec(arr.shape, lambda b: (0,) * nd)
    return pl.BlockSpec(arr.shape, lambda b, h: (0,) * nd)


def channel_gate(x, tab, params, *, force_two_pass=False, tile_hw=None):
    """x: (B, C, H, W) float32, tab: (B, tab_dim) float32."""
    B, C, H, W = x.shape
    hw = H * W
    x_flat = x.reshape(B, C, hw)                  # contiguous -> metadata only
    tab3 = tab.reshape(B, 1, tab.shape[-1])       # (B, 1, T)
    T = tab3.shape[-1]

    param_args = tuple(params[k] for k in _PARAM_ORDER)
    param_bytes = sum(int(p.size) * p.dtype.itemsize for p in param_args)
    tab_bytes = int(tab3.size) * tab3.dtype.itemsize
    overhead = 2 * (param_bytes + tab_bytes) + (2 << 20)

    budget = _vmem_budget_bytes()
    sample_bytes = C * hw * x_flat.dtype.itemsize
    single_pass_ok = (4 * sample_bytes + overhead) <= budget

    if single_pass_ok and not force_two_pass:
        block_b = _pick_block_b(B, sample_bytes, overhead, budget)
        vmem_limit = int(min(max(4 * block_b * sample_bytes + overhead,
                                 16 << 20), budget))
        grid = (B // block_b,)
        in_specs = ([pl.BlockSpec((block_b, C, hw), lambda b: (b, 0, 0)),
                     pl.BlockSpec((block_b, 1, T), lambda b: (b, 0, 0))]
                    + [_resident_spec(p, 1) for p in param_args])
        out_flat = pl.pallas_call(
            functools.partial(channel_gate_kernel, hw),
            grid=grid,
            out_shape=jax.ShapeDtypeStruct((B, C, hw), x.dtype),
            in_specs=in_specs,
            out_specs=pl.BlockSpec((block_b, C, hw), lambda b: (b, 0, 0)),
            compiler_params=pltpu.CompilerParams(
                dimension_semantics=("parallel",),
                vmem_limit_bytes=vmem_limit),
        )(x_flat, tab3, *param_args)
        return out_flat.reshape(B, C, H, W)

    # ---- two-pass fallback: whole sample does not fit VMEM (e.g. v7x) -----
    if tile_hw is None:
        lane_budget = max(128, (2 << 20) // (C * x_flat.dtype.itemsize))
        thw = max(128, (lane_budget // 128) * 128)
        thw = min(thw, ((hw + 127) // 128) * 128)
    else:
        thw = int(tile_hw)
    n_hw = pl.cdiv(hw, thw)
    tile_bytes = C * thw * x_flat.dtype.itemsize

    # Pass 1: pooling + MLP -> scale (B, 1, C).
    vmem_a = int(min(max(2 * tile_bytes + overhead, 16 << 20), budget))
    scale3 = pl.pallas_call(
        functools.partial(pool_mlp_kernel, hw, thw),
        grid=(B, n_hw),
        out_shape=jax.ShapeDtypeStruct((B, 1, C), jnp.float32),
        in_specs=([pl.BlockSpec((1, C, thw), lambda b, h: (b, 0, h)),
                   pl.BlockSpec((1, 1, T), lambda b, h: (b, 0, 0))]
                  + [_resident_spec(p, 2) for p in param_args]),
        out_specs=pl.BlockSpec((1, 1, C), lambda b, h: (b, 0, 0)),
        scratch_shapes=[pltpu.VMEM((1, C), jnp.float32),
                        pltpu.VMEM((1, C), jnp.float32)],
        compiler_params=pltpu.CompilerParams(
            dimension_semantics=("parallel", "arbitrary"),
            vmem_limit_bytes=vmem_a),
    )(x_flat, tab3, *param_args)

    # Pass 2: out = x * scale, tiled over (B, HW).
    vmem_b = int(min(max(4 * tile_bytes + (4 << 20), 16 << 20), budget))
    out_flat = pl.pallas_call(
        scale_mul_kernel,
        grid=(B, n_hw),
        out_shape=jax.ShapeDtypeStruct((B, C, hw), x.dtype),
        in_specs=[pl.BlockSpec((1, C, thw), lambda b, h: (b, 0, h)),
                  pl.BlockSpec((1, 1, C), lambda b, h: (b, 0, 0))],
        out_specs=pl.BlockSpec((1, C, thw), lambda b, h: (b, 0, h)),
        compiler_params=pltpu.CompilerParams(
            dimension_semantics=("parallel", "parallel"),
            vmem_limit_bytes=vmem_b),
    )(x_flat, scale3)
    return out_flat.reshape(B, C, H, W)


# ---------------------------------------------------------------------------
# Pure-JAX reference + test harness
# ---------------------------------------------------------------------------
def reference(x, tab, p):
    avg = x.mean(axis=(2, 3))
    mx = x.max(axis=(2, 3))

    def mlp(v):
        h = jnp.maximum(v @ p["w1"] + p["b1"], 0.0)
        return h @ p["w2"] + p["b2"]

    emb = jnp.maximum(tab @ p["tw1"] + p["tb1"], 0.0) @ p["tw2"] + p["tb2"]
    att = mlp(avg) + mlp(mx) + mlp(emb)
    return x * jax.nn.sigmoid(att)[:, :, None, None]


def _make_params(key, C, CR, TAB_DIM):
    ks = jax.random.split(key, 8)
    return {
        "w1":  0.2 * jax.random.normal(ks[0], (C, CR), dtype=jnp.float32),
        "b1":  0.1 * jax.random.normal(ks[1], (1, CR), dtype=jnp.float32),
        "w2":  0.2 * jax.random.normal(ks[2], (CR, C), dtype=jnp.float32),
        "b2":  0.1 * jax.random.normal(ks[3], (1, C), dtype=jnp.float32),
        "tw1": 0.2 * jax.random.normal(ks[4], (TAB_DIM, CR), dtype=jnp.float32),
        "tb1": 0.1 * jax.random.normal(ks[5], (1, CR), dtype=jnp.float32),
        "tw2": 0.2 * jax.random.normal(ks[6], (CR, C), dtype=jnp.float32),
        "tb2": 0.1 * jax.random.normal(ks[7], (1, C), dtype=jnp.float32),
    }


if __name__ == "__main__":
    TAB_DIM = 6

    def run_case(key, B, C, H, W, red, **kw):
        CR = max(1, C // red)
        kx, kt, kp = jax.random.split(key, 3)
        x = jax.random.normal(kx, (B, C, H, W), dtype=jnp.float32)
        tab = jax.random.normal(kt, (B, TAB_DIM), dtype=jnp.float32)
        p = _make_params(kp, C, CR, TAB_DIM)
        out = jax.block_until_ready(channel_gate(x, tab, p, **kw))
        ref = reference(x, tab, p)
        assert out.shape == x.shape
        assert jnp.allclose(out, ref, atol=1e-4, rtol=1e-4), (
            f"mismatch: B={B} C={C} H={H} W={W} kw={kw}")

    keys = jax.random.split(jax.random.PRNGKey(0), 4)
    # 1) lane-aligned HW (16x16=256), even batch -> single-pass, grid of 2.
    run_case(keys[0], 2, 32, 16, 16, 16)
    # 2) non-128-multiple HW (7x7=49), odd batch -> single-pass, masked store.
    run_case(keys[1], 3, 32, 7, 7, 16)
    # 3) forced two-pass fallback, multi-tile HW with a ragged edge tile.
    run_case(keys[2], 2, 32, 12, 12, 16, force_two_pass=True, tile_hw=128)
    # 4) forced two-pass fallback, aligned multi-tile HW, odd batch.
    run_case(keys[3], 3, 32, 16, 16, 16, force_two_pass=True, tile_hw=128)

    print("KERNEL_OK")
</pallas_src>

<mosaic_0001>
module attributes {stable_mosaic.version = 11 : i64} {
  func.func @channel_gate_kernel(%arg0: i32, %arg1: memref<1x32x256xf32, #tpu.memory_space<vmem>>, %arg2: memref<1x1x6xf32, #tpu.memory_space<vmem>>, %arg3: memref<32x2xf32, #tpu.memory_space<vmem>>, %arg4: memref<1x2xf32, #tpu.memory_space<vmem>>, %arg5: memref<2x32xf32, #tpu.memory_space<vmem>>, %arg6: memref<1x32xf32, #tpu.memory_space<vmem>>, %arg7: memref<6x2xf32, #tpu.memory_space<vmem>>, %arg8: memref<1x2xf32, #tpu.memory_space<vmem>>, %arg9: memref<2x32xf32, #tpu.memory_space<vmem>>, %arg10: memref<1x32xf32, #tpu.memory_space<vmem>>, %arg11: memref<1x32x256xf32, #tpu.memory_space<vmem>>) attributes {dimension_semantics = [#tpu.dimension_semantics<parallel>], iteration_bounds = array<i64: 2>, scalar_prefetch = 0 : i64, scratch_operands = 0 : i64, tpu.core_type = #tpu.core_type<tc>, window_params = [{transform_indices = @transform_0, window_bounds = array<i64: 1, 32, 256>}, {transform_indices = @transform_1, window_bounds = array<i64: 1, 1, 6>}, {pipeline_mode = #tpu.pipeline_mode<synchronous>, transform_indices = @transform_2, window_bounds = array<i64: 32, 2>}, {pipeline_mode = #tpu.pipeline_mode<synchronous>, transform_indices = @transform_3, window_bounds = array<i64: 1, 2>}, {pipeline_mode = #tpu.pipeline_mode<synchronous>, transform_indices = @transform_4, window_bounds = array<i64: 2, 32>}, {pipeline_mode = #tpu.pipeline_mode<synchronous>, transform_indices = @transform_5, window_bounds = array<i64: 1, 32>}, {pipeline_mode = #tpu.pipeline_mode<synchronous>, transform_indices = @transform_6, window_bounds = array<i64: 6, 2>}, {pipeline_mode = #tpu.pipeline_mode<synchronous>, transform_indices = @transform_7, window_bounds = array<i64: 1, 2>}, {pipeline_mode = #tpu.pipeline_mode<synchronous>, transform_indices = @transform_8, window_bounds = array<i64: 2, 32>}, {pipeline_mode = #tpu.pipeline_mode<synchronous>, transform_indices = @transform_9, window_bounds = array<i64: 1, 32>}, {transform_indices = @transform_10, window_bounds = array<i64: 1, 32, 256>}]} {
    %c0 = arith.constant 0 : index
    %c0_0 = arith.constant 0 : index
    %c0_1 = arith.constant 0 : index
    %0 = vector.load %arg1[%c0, %c0_0, %c0_1] : memref<1x32x256xf32, #tpu.memory_space<vmem>>, vector<1x32x256xf32>
    %cst = arith.constant dense<0.000000e+00> : vector<1x32xf32>
    %1 = vector.multi_reduction <add>, %0, %cst [2] : vector<1x32x256xf32> to vector<1x32xf32>
    %cst_2 = arith.constant 3.906250e-03 : f32
    %2 = vector.broadcast %cst_2 : f32 to vector<1x32xf32>
    %3 = arith.mulf %1, %2 : vector<1x32xf32>
    %cst_3 = arith.constant dense<0xFF800000> : vector<1x32xf32>
    %4 = vector.multi_reduction <maximumf>, %0, %cst_3 [2] : vector<1x32x256xf32> to vector<1x32xf32>
    %c0_4 = arith.constant 0 : index
    %c0_5 = arith.constant 0 : index
    %c0_6 = arith.constant 0 : index
    %5 = vector.load %arg2[%c0_4, %c0_5, %c0_6] : memref<1x1x6xf32, #tpu.memory_space<vmem>>, vector<1x1x6xf32>
    %6 = vector.shape_cast %5 : vector<1x1x6xf32> to vector<1x6xf32>
    %c0_7 = arith.constant 0 : index
    %c0_8 = arith.constant 0 : index
    %7 = vector.load %arg3[%c0_7, %c0_8] : memref<32x2xf32, #tpu.memory_space<vmem>>, vector<32x2xf32>
    %c0_9 = arith.constant 0 : index
    %c0_10 = arith.constant 0 : index
    %8 = vector.load %arg4[%c0_9, %c0_10] : memref<1x2xf32, #tpu.memory_space<vmem>>, vector<1x2xf32>
    %c0_11 = arith.constant 0 : index
    %c0_12 = arith.constant 0 : index
    %9 = vector.load %arg5[%c0_11, %c0_12] : memref<2x32xf32, #tpu.memory_space<vmem>>, vector<2x32xf32>
    %c0_13 = arith.constant 0 : index
    %c0_14 = arith.constant 0 : index
    %10 = vector.load %arg6[%c0_13, %c0_14] : memref<1x32xf32, #tpu.memory_space<vmem>>, vector<1x32xf32>
    %c0_15 = arith.constant 0 : index
    %c0_16 = arith.constant 0 : index
    %11 = vector.load %arg7[%c0_15, %c0_16] : memref<6x2xf32, #tpu.memory_space<vmem>>, vector<6x2xf32>
    %c0_17 = arith.constant 0 : index
    %c0_18 = arith.constant 0 : index
    %12 = vector.load %arg8[%c0_17, %c0_18] : memref<1x2xf32, #tpu.memory_space<vmem>>, vector<1x2xf32>
    %c0_19 = arith.constant 0 : index
    %c0_20 = arith.constant 0 : index
    %13 = vector.load %arg9[%c0_19, %c0_20] : memref<2x32xf32, #tpu.memory_space<vmem>>, vector<2x32xf32>
    %c0_21 = arith.constant 0 : index
    %c0_22 = arith.constant 0 : index
    %14 = vector.load %arg10[%c0_21, %c0_22] : memref<1x32xf32, #tpu.memory_space<vmem>>, vector<1x32xf32>
    %cst_23 = arith.constant dense<0.000000e+00> : vector<1x2xf32>
    %15 = tpu.matmul %6, %11, %cst_23 {dimension_numbers = #tpu.dot_dimension_numbers<[1], [0], [0], [1], [0, 0, 1, 1], [], []>} : vector<1x6xf32>, vector<6x2xf32>, vector<1x2xf32> -> vector<1x2xf32>
    %16 = arith.addf %15, %12 : vector<1x2xf32>
    %cst_24 = arith.constant 0.000000e+00 : f32
    %17 = vector.broadcast %cst_24 : f32 to vector<1x2xf32>
    %18 = arith.maximumf %16, %17 : vector<1x2xf32>
    %cst_25 = arith.constant dense<0.000000e+00> : vector<1x32xf32>
    %19 = tpu.matmul %18, %13, %cst_25 {dimension_numbers = #tpu.dot_dimension_numbers<[1], [0], [0], [1], [0, 0, 1, 1], [], []>} : vector<1x2xf32>, vector<2x32xf32>, vector<1x32xf32> -> vector<1x32xf32>
    %20 = arith.addf %19, %14 : vector<1x32xf32>
    %cst_26 = arith.constant dense<0.000000e+00> : vector<1x2xf32>
    %21 = tpu.matmul %3, %7, %cst_26 {dimension_numbers = #tpu.dot_dimension_numbers<[1], [0], [0], [1], [0, 0, 1, 1], [], []>} : vector<1x32xf32>, vector<32x2xf32>, vector<1x2xf32> -> vector<1x2xf32>
    %22 = arith.addf %21, %8 : vector<1x2xf32>
    %cst_27 = arith.constant 0.000000e+00 : f32
    %23 = vector.broadcast %cst_27 : f32 to vector<1x2xf32>
    %24 = arith.maximumf %22, %23 : vector<1x2xf32>
    %cst_28 = arith.constant dense<0.000000e+00> : vector<1x2xf32>
    %25 = tpu.matmul %4, %7, %cst_28 {dimension_numbers = #tpu.dot_dimension_numbers<[1], [0], [0], [1], [0, 0, 1, 1], [], []>} : vector<1x32xf32>, vector<32x2xf32>, vector<1x2xf32> -> vector<1x2xf32>
    %26 = arith.addf %25, %8 : vector<1x2xf32>
    %cst_29 = arith.constant 0.000000e+00 : f32
    %27 = vector.broadcast %cst_29 : f32 to vector<1x2xf32>
    %28 = arith.maximumf %26, %27 : vector<1x2xf32>
    %29 = arith.addf %24, %28 : vector<1x2xf32>
    %cst_30 = arith.constant dense<0.000000e+00> : vector<1x2xf32>
    %30 = tpu.matmul %20, %7, %cst_30 {dimension_numbers = #tpu.dot_dimension_numbers<[1], [0], [0], [1], [0, 0, 1, 1], [], []>} : vector<1x32xf32>, vector<32x2xf32>, vector<1x2xf32> -> vector<1x2xf32>
    %31 = arith.addf %30, %8 : vector<1x2xf32>
    %cst_31 = arith.constant 0.000000e+00 : f32
    %32 = vector.broadcast %cst_31 : f32 to vector<1x2xf32>
    %33 = arith.maximumf %31, %32 : vector<1x2xf32>
    %34 = arith.addf %29, %33 : vector<1x2xf32>
    %cst_32 = arith.constant dense<0.000000e+00> : vector<1x32xf32>
    %35 = tpu.matmul %34, %9, %cst_32 {dimension_numbers = #tpu.dot_dimension_numbers<[1], [0], [0], [1], [0, 0, 1, 1], [], []>} : vector<1x2xf32>, vector<2x32xf32>, vector<1x32xf32> -> vector<1x32xf32>
    %cst_33 = arith.constant 3.000000e+00 : f32
    %36 = vector.broadcast %cst_33 : f32 to vector<1x32xf32>
    %37 = arith.mulf %36, %10 : vector<1x32xf32>
    %38 = arith.addf %35, %37 : vector<1x32xf32>
    %39 = arith.negf %38 : vector<1x32xf32>
    %40 = math.exp %39 : vector<1x32xf32>
    %cst_34 = arith.constant 1.000000e+00 : f32
    %41 = vector.broadcast %cst_34 : f32 to vector<1x32xf32>
    %42 = arith.addf %41, %40 : vector<1x32xf32>
    %43 = arith.divf %41, %42 : vector<1x32xf32>
    %c0_35 = arith.constant 0 : index
    %c0_36 = arith.constant 0 : index
    %c0_37 = arith.constant 0 : index
    %44 = vector.load %arg1[%c0_35, %c0_36, %c0_37] : memref<1x32x256xf32, #tpu.memory_space<vmem>>, vector<1x32x256xf32>
    %45 = vector.shape_cast %43 : vector<1x32xf32> to vector<1x32x1xf32>
    %46 = vector.broadcast %45 : vector<1x32x1xf32> to vector<1x32x256xf32>
    %47 = arith.mulf %44, %46 : vector<1x32x256xf32>
    %c0_38 = arith.constant 0 : index
    %c0_39 = arith.constant 0 : index
    %c0_40 = arith.constant 0 : index
    %48 = vector.load %arg11[%c0_38, %c0_39, %c0_40] : memref<1x32x256xf32, #tpu.memory_space<vmem>>, vector<1x32x256xf32>
    tpu.vector_store %arg11[%c0_38, %c0_39, %c0_40], %47 {strides = array<i32>} : memref<1x32x256xf32, #tpu.memory_space<vmem>>, vector<1x32x256xf32>,
    return
  }
  func.func @transform_0(%arg0: i32) -> (i32, i32, i32) {
    %c0_i32 = arith.constant 0 : i32
    %c0_i32_0 = arith.constant 0 : i32
    %c0_i32_1 = arith.constant 0 : i32
    return %arg0, %c0_i32, %c0_i32_0 : i32, i32, i32
  }
  func.func @transform_1(%arg0: i32) -> (i32, i32, i32) {
    %c0_i32 = arith.constant 0 : i32
    %c0_i32_0 = arith.constant 0 : i32
    %c0_i32_1 = arith.constant 0 : i32
    return %arg0, %c0_i32, %c0_i32_0 : i32, i32, i32
  }
  func.func @transform_2(%arg0: i32) -> (i32, i32) {
    %c0_i32 = arith.constant 0 : i32
    %c0_i32_0 = arith.constant 0 : i32
    %c0_i32_1 = arith.constant 0 : i32
    return %c0_i32, %c0_i32_0 : i32, i32
  }
  func.func @transform_3(%arg0: i32) -> (i32, i32) {
    %c0_i32 = arith.constant 0 : i32
    %c0_i32_0 = arith.constant 0 : i32
    %c0_i32_1 = arith.constant 0 : i32
    return %c0_i32, %c0_i32_0 : i32, i32
  }
  func.func @transform_4(%arg0: i32) -> (i32, i32) {
    %c0_i32 = arith.constant 0 : i32
    %c0_i32_0 = arith.constant 0 : i32
    %c0_i32_1 = arith.constant 0 : i32
    return %c0_i32, %c0_i32_0 : i32, i32
  }
  func.func @transform_5(%arg0: i32) -> (i32, i32) {
    %c0_i32 = arith.constant 0 : i32
    %c0_i32_0 = arith.constant 0 : i32
    %c0_i32_1 = arith.constant 0 : i32
    return %c0_i32, %c0_i32_0 : i32, i32
  }
  func.func @transform_6(%arg0: i32) -> (i32, i32) {
    %c0_i32 = arith.constant 0 : i32
    %c0_i32_0 = arith.constant 0 : i32
    %c0_i32_1 = arith.constant 0 : i32
    return %c0_i32, %c0_i32_0 : i32, i32
  }
  func.func @transform_7(%arg0: i32) -> (i32, i32) {
    %c0_i32 = arith.constant 0 : i32
    %c0_i32_0 = arith.constant 0 : i32
    %c0_i32_1 = arith.constant 0 : i32
    return %c0_i32, %c0_i32_0 : i32, i32
  }
  func.func @transform_8(%arg0: i32) -> (i32, i32) {
    %c0_i32 = arith.constant 0 : i32
    %c0_i32_0 = arith.constant 0 : i32
    %c0_i32_1 = arith.constant 0 : i32
    return %c0_i32, %c0_i32_0 : i32, i32
  }
  func.func @transform_9(%arg0: i32) -> (i32, i32) {
    %c0_i32 = arith.constant 0 : i32
    %c0_i32_0 = arith.constant 0 : i32
    %c0_i32_1 = arith.constant 0 : i32
    return %c0_i32, %c0_i32_0 : i32, i32
  }
  func.func @transform_10(%arg0: i32) -> (i32, i32, i32) {
    %c0_i32 = arith.constant 0 : i32
    %c0_i32_0 = arith.constant 0 : i32
    %c0_i32_1 = arith.constant 0 : i32
    return %arg0, %c0_i32, %c0_i32_0 : i32, i32, i32
  }
}

</mosaic_0001>

<bundles_post_ra>
// kernel: tpu_custom_call.1
= control target key start
LH: loop header
LB: loop body
LE: loop exit
PB: predicated region body
PF: predicated region fallthrough
CT: control target
= control target key end

     0   :  { %15 = vsyncpa [#allocation3], 0  ;;  %s1713_s0 = inlined_call_operand.hbm [shape: f32[2,32,256], index: 0, kind: input, shape index: {}]   ;;  %s1714_s1 = inlined_call_operand.vmem [shape: f32[2,1,6], index: 1, kind: input, shape index: {}]   ;;  %s1715_s2 = inlined_call_operand.vmem [shape: f32[32,2], index: 2, kind: input, shape index: {}]   ;;  %s1716_s3 = inlined_call_operand.vmem [shape: f32[1,2], index: 3, kind: input, shape index: {}]   ;;  %s1717_s4 = inlined_call_operand.vmem [shape: f32[2,32], index: 4, kind: input, shape index: {}]   ;;  %s1718_s5 = inlined_call_operand.vmem [shape: f32[1,32], index: 5, kind: input, shape index: {}]   ;;  %s1719_s6 = inlined_call_operand.vmem [shape: f32[6,2], index: 6, kind: input, shape index: {}]   ;;  %s1720_s7 = inlined_call_operand.vmem [shape: f32[1,2], index: 7, kind: input, shape index: {}]   ;;  %s1721_s8 = inlined_call_operand.vmem [shape: f32[2,32], index: 8, kind: input, shape index: {}]   ;;  %s1722_s9 = inlined_call_operand.vmem [shape: f32[1,32], index: 9, kind: input, shape index: {}]   ;;  %s1723_s10 = inlined_call_operand.hbm [shape: f32[2,32,256], index: 10, kind: output, shape index: {}]  }
   0x1   :  { %17 = vsyncpa [#allocation3 + $0x1], 0 }
   0x2   :  { %18 = vsyncpa [#allocation4], 0 }
   0x3   :  { %20 = vsyncpa [#allocation4 + $0x1], 0  ;;  %s1420_s13 = smov 0   ;;  %s1422_s14 = smov 0  }
   0x4   :  { %s1424_s15 = smov 0   ;;  %s1426_s16 = smov 0  }
   0x5 LB: > { %s1441_s17 = sadd.s32 4294967295, %s1354_s16   ;;  %s1088_s18 = sadd.s32 4294967294, %s1354_s16   ;;  %s1354_s16 = sphi %s1426_s16, %s1738_s16   ;;  %s1350_s15 = sphi %s1424_s15, %s1737_s15   ;;  %s1346_s14 = sphi %s1422_s14, %s1736_s14   ;;  %s1342_s13 = sphi %s1420_s13, %s1735_s13  }
   0x6   : > { %s1445_s19 = sadd.s32 1, %s1354_s16   ;;  %s33_s20 = sadd.s32 1, %s1350_s15 }
   0x7   : > { %s30_s21 = ssub.s32 %s1354_s16, %s1445_s19  ;;  %p40_p0 = scmp.ne.s32.totalorder %s1350_s15, %s1346_s14 }
   0x8   : > { %p31_p1 = scmp.eq.s32.totalorder %s30_s21, 0  ;;  %p41_p2 = scmp.eq.s32.totalorder %s1354_s16, 0 }
   0x9   : > { %p46_p3 = scmp.ne.s32.totalorder %s1346_s14, %s1342_s13  ;;  %p47_p4 = scmp.eq.s32.totalorder %s1441_s17, 0 }
   0xa   : > { %s1457_s22 = scalar_select %p31_p1, %s1350_s15, %s33_s20  }
   0xb   : > { %p1459_p5 = por %p41_p2, %p40_p0  ;;  %p1463_p6 = por %p47_p4, %p46_p3 }
   0xc   : > { %1725 = sst [smem:[#allocation8_spill]] %s1457_s22  ;;  %p264_p7 = scmp.eq.s32.totalorder %s1441_s17, 1 }
   0xd   : > { %p270_p8 = scmp.eq.s32.totalorder %s1088_s18, 1  ;;  %p1213_p10 = scmp.lt.s32.totalorder %s1354_s16, 2 }
   0xe   : > { %p1470_p11 = por %p264_p7, %p40_p0  ;;  %s314_s27 = sand.u32 1, %s1350_s15  }
   0xf   : > { %p1474_p12 = por %p270_p8, %p46_p3  ;;  %s1112_s28 = sshll.u32 %s1354_s16, 10 }
  0x10   : > { %s1728_s25 = scalar_select %p1470_p11, 1, 0 }
  0x11   : > { %s1729_s26 = scalar_select %p1474_p12, 1, 0 }
  0x12   : > { %s1091_s29 = sshll.u32 %s314_s27, 6  ;;  %s1483_s12 = scalar_lea.hbm %s1713_s0, %s1112_s28 }
  0x13   : > { %s318_s18 = scalar_lea.vmem [#allocation2], %s1091_s29  ;;  %p1487_p13 = pnand %p1213_p10, %p1459_p5 }
  0x14   : > { %s325_s20 = sshll.u32 %s318_s18, 4  ;;  %s1493_s22 = scalar_lea.sflag [#allocation3], %s314_s27  ;;  %s1491_s20 = int_to_ptr.vmem [resolvable:$true] %s325_s20 }
  0x15   : > { %s1258_s30 = scalar_lea.hbm %s1483_s12, 1024  ;;  %p1260_p1 = pneg %p1487_p13 }
  0x16   : > { %p1259_p0 = scmp.ne.s32.totalorder %s1483_s12, %s1258_s30  ;;  %s1263_s29 = scalar_lea.hbm %s1713_s0, 2048 }
  0x17   : > { %p1264_p4 = scmp.lt.u32.totalorder %s1483_s12, %s1713_s0  ;;  %p1265_p5 = scmp.lt.u32.totalorder %s1263_s29, %s1258_s30 }
  0x18   : > { %p1261_p2 = pnand %p1260_p1, %p1259_p0  ;;  %p1267_p8 = scmp.lt.u32.totalorder %s1258_s30, %s1483_s12 }
  0x19   : > { %p1266_p7 = por %p1265_p5, %p1264_p4 }
  0x1a   : > { %p1262_p3 = pneg %p1261_p2 }
  0x1b   : > { %p1268_p10 = por %p1267_p8, %p1266_p7 }
  0x1d   : > { %p1269_p9 = pnand %p1268_p10, %p1262_p3 }
  0x1f   : > { %1272 = shalt.err (!%p1269_p9)
}
  0x20   : > { %s1273_s27 = scalar_lea.vmem %s1491_s20, 1024  ;;  %s1356_s28 = smov [#allocation2]  }
  0x21   : > { %p1274_p0 = scmp.ne.s32.totalorder %s1491_s20, %s1273_s27  ;;  %s1278_s23 = sshll.u32 %s1356_s28, 4  ;;  %s1279_s23 = int_to_ptr.vmem [resolvable:$false] %s1278_s23 }
  0x22   : > { %s1280_s11 = scalar_lea.vmem %s1279_s23, 2048  ;;  %p1281_p11 = scmp.lt.s32.totalorder %s1491_s20, %s1279_s23 }
  0x23   : > { %p1276_p2 = pnand %p1274_p0, %p1260_p1  ;;  %p1282_p4 = scmp.lt.s32.totalorder %s1280_s11, %s1273_s27 }
  0x25   : > { %p1277_p12 = pneg %p1276_p2  ;;  %p1283_p5 = por %p1282_p4, %p1281_p11 }
  0x27   : > { %p1284_p7 = pnand %p1283_p5, %p1277_p12 }
  0x29   : > { %1287 = shalt.err (!%p1284_p7)
}
  0x2a   : > { %s1357_s30 = smov 256   ;;  %s1358_s29 = smov 16  }
  0x2b   : > { %1208 = dma.hbm_to_vmem [thread:$0]  (!%p1487_p13), %s1483_s12, 1024, %s1491_s20, %s1493_s22, %s1357_s30, %s1357_s30, %s1358_s29  }
  0x2c   : > { %p1094_p9 = scmp.ge.s32.totalorder %s1354_s16, 1  ;;  %p339_p1 = scmp.lt.s32.totalorder %s1354_s16, 3 }
  0x2e   : > { %p340_p3 = pnand %p1094_p9, %p339_p1 }
  0x2f   : > { %s1524_s18 = sand.u32 (!%p340_p3), 1, %s1346_s14  }
  0x30   : > { %343 = sbr.rel (%p340_p3) target bundleno = 1092 (0x444), region = 60  ;;  %s1095_s27 = sshll.u32 (!%p340_p3), %s1524_s18, 6 }
  0x31   : > { %s346_s28 = scalar_lea.sflag (!%p340_p3), [#allocation3], %s1524_s18  ;;  %s1530_s23 = scalar_lea.vmem (!%p340_p3), [#allocation2], %s1095_s27 }
  0x37   : > { %1333 = dma.done.wait (%p1463_p6), %s346_s28, 1024  }
  0x38   : > { %1335 = vsyncadd (%p1463_p6), %s346_s28, 4294966272  ;;  %p389_p11 = scmp.lt.s32.totalorder %s1441_s17, 1  ;;  %v1359_v0 = vmov 0.0   ;;  %vm1360_vm0 = vmmov 0   ;;  %vm444_vm1 = vcmask 1045504   ;;  %vm440_vm2 = vcmask 48128  }
  0x39   : > { %1135 = vmatprep.subr.mxu0 %v1359_v0  ;;  %1137 = vmatprep.mubr.msk.f32.mxu0 %vm1360_vm0, %v1359_v0  ;;  %v436_v1 = vld [vmem:[%s1719_s6] sm:$0x3f]  ;;  %vm523_vm3 = vcmask 1041408   ;;  %v1560_v5 = vld [vmem:[%s1530_s23 + $0x8] sm:$0xff]  ;;  %v1571_v9 = vld [vmem:[%s1530_s23 + $0x10] sm:$0xff]  ;;  %v1361_v22 = vmov 0.0|0.0   ;;  %v601_v32 = vlaneseq }
  0x3a   : > { %s390_s22 = scalar_select %p389_p11, %s1441_s17, 1  ;;  %1140 = vmatprep.subr.mxu1 %v1359_v0  ;;  %1142 = vmatprep.mubr.msk.f32.mxu1 %vm1360_vm0, %v1359_v0  ;;  %v438_v3 = vld [vmem:[%s1721_s8] sm:$0x3]  ;;  %v1568_v8 = vld [vmem:[%s1530_s23 + $0x28] sm:$0xff]  ;;  %v1574_v10 = vld [vmem:[%s1530_s23 + $0x18] sm:$0xff]  ;;  %vm519_vm4 = vcmask 15360  }
  0x3b   : > { %1136 = vmatpush3.msk.msra.mxu0 %vm444_vm1, %v436_v1  ;;  %1141 = vmatpush3.msk.msra.mxu1 %vm523_vm3, %v438_v3  ;;  %v1557_v4 = vld [vmem:[%s1530_s23] sm:$0xff]  ;;  %v1579_v12 = vld [vmem:[%s1530_s23 + $0x30] sm:$0xff]  ;;  %v1582_v13 = vld [vmem:[%s1530_s23 + $0x38] sm:$0xff]  ;;  %v403_v14 = vadd.f32 %v1574_v10, %v1571_v9  ;;  %v419_v17 = vmax.f32 %v1571_v9, %v1574_v10  ;;  %v602_v33 = vand.u32 127, %v601_v32  ;;  %v1620_v34 = vshrl.u32 %v601_v32, 7  ;;  %s388_s30 = scalar_lea.vmem [#allocation5], %s1095_s27 }
  0x3c   : > { %s391_s20 = scalar_lea.vmem %s1714_s1, %s390_s22  ;;  %v1563_v6 = vld [vmem:[%s1530_s23 + $0x20] sm:$0xff]  ;;  %v400_v7 = vadd.f32 %v1560_v5, %v1557_v4  ;;  %v409_v15 = vadd.f32 %v1582_v13, %v1579_v12  ;;  %v416_v16 = vmax.f32 %v1557_v4, %v1560_v5  ;;  %v425_v19 = vmax.f32 %v1579_v12, %v1582_v13  ;;  %v430_v21 = vld [vmem:[%s1715_s2 + $0x8] sm:$0xff]  ;;  %1183 = vmatprep.subr.bf16.mxu0 %v1361_v22  ;;  %v431_v24 = vld [vmem:[%s1715_s2 + $0x10] sm:$0xff]  ;;  %s1006_s29 = sshll.u32 %s388_s30, 4  ;;  %s1662_s29 = int_to_ptr.vmem [resolvable:$true] %s1006_s29 }
  0x3d   : > { %v428_v2 = vld [vmem:[%s391_s20] sm:$0x1]  ;;  %v406_v11 = vadd.f32 %v1568_v8, %v1563_v6  ;;  %v422_v18 = vmax.f32 %v1563_v6, %v1568_v8  ;;  %1189 = vmatprep.subr.bf16.mxu1 %v1361_v22  ;;  %v432_v25 = vld [vmem:[%s1715_s2 + $0x18] sm:$0xff]  ;;  %v614_v35 = vadd.s32 4294967280, %v602_v33  ;;  %v607_v36 = vadd.s32 4294967288, %v602_v33  ;;  %s1113_s28 = sshll.u32 %s1441_s17, 10 }
  0x3e   : > { %1138 = vmatmul.mubr.msk.f32.vlgmr.msra.gmra.mrb[0].mxu0 %vm440_vm2, %v428_v2  ;;  %401 = vadd.xlane.f32.xlu0 %v400_v7  ;;  %v429_v20 = vld [vmem:[%s1715_s2] sm:$0xff]  ;;  %v1187_v26 = vpack.c.bf16 %v432_v25, %v431_v24  ;;  %v621_v38 = vadd.s32 4294967272, %v602_v33  ;;  %v605_v39 = vsub.s32 %v602_v33, %v1620_v34  ;;  %vm612_vm5 = vcmask 130112   ;;  %s1667_s22 = scalar_lea.hbm %s1723_s10, %s1113_s28  ;;  %s993_s17 = scalar_lea.sflag [#allocation4], %s1524_s18 }
  0x3f   : > { %1153 = vmatprep.mubr.msk.f32.mxu0 %vm1360_vm0, %v1359_v0  ;;  %407 = vadd.xlane.f32.xlu1 %v406_v11  ;;  %v1184_v23 = vpack.c.bf16 %v430_v21, %v429_v20  ;;  %v437_v27 = vld [vmem:[%s1720_s7] sm:$0x1]  ;;  %v617_v42 = vsub.s32 %v614_v35, %v1620_v34  ;;  %v610_v44 = vsub.s32 %v607_v36, %v1620_v34  ;;  %vm619_vm6 = vcmask 195712   ;;  %s1288_s24 = scalar_lea.vmem %s1662_s29, 1024  ;;  %p1731_p12 = scmp.ne.s32.totalorder %s1728_s25, 0 }
  0x40   : > { %v624_v46 = vsub.s32 %v621_v38, %v1620_v34  ;;  %vm626_vm7 = vcmask 261312   ;;  %vm628_vm8 = vcmask 261120   ;;  %v439_v11 = vld [vmem:[%s1722_s9] sm:$0x1]  ;;  %p1289_p6 = scmp.ne.s32.totalorder %s1662_s29, %s1288_s24  ;;  %s1362_s12 = smov [#allocation5]  }
  0x41   : > { %1185 = vmatpush3.bf16.msra.mxu0 %v1184_v23  ;;  %v435_v32 = vld [vmem:[%s1718_s5] sm:$0x1]  ;;  %s1292_s20 = sshll.u32 %s1362_s12, 4  ;;  %s1293_s20 = int_to_ptr.vmem [resolvable:$false] %s1292_s20 }
  0x42   : > { %404 = vadd.xlane.f32.xlu0 %v403_v14  ;;  %1186 = vmatprep.subr.bf16.mxu0 %v1361_v22  ;;  %v874_v33 = vmul.f32 3.0, %v435_v32  ;;  %p1290_p13 = pnand %p1289_p6, %p1731_p12  ;;  %s1294_s21 = scalar_lea.vmem %s1293_s20, 2048 }
  0x43   : > { %410 = vadd.xlane.f32.xlu1 %v409_v15  ;;  %p1295_p10 = scmp.lt.s32.totalorder %s1662_s29, %s1293_s20  ;;  %p1296_p0 = scmp.lt.s32.totalorder %s1294_s21, %s1288_s24 }
  0x44   : > { %p1291_p8 = pneg %p1290_p13 }
  0x45   : > { %1188 = vmatpush3.bf16.msra.mxu0 %v1187_v26  ;;  %p1297_p2 = por %p1296_p0, %p1295_p10 }
  0x46   : > { %417 = vmax.xlane.f32.xlu0 %v416_v16  ;;  %1195 = vmatprep.subr.bf16.mxu0 %v1361_v22 }
  0x47   : > { %420 = vmax.xlane.f32.xlu1 %v419_v17  ;;  %v433_v17 = vld [vmem:[%s1716_s3] sm:$0x1]  ;;  %p1298_p4 = pnand %p1297_p2, %p1291_p8 }
  0x4a   : > { %423 = vmax.xlane.f32.xlu0 %v422_v18 }
  0x4b   : > { %426 = vmax.xlane.f32.xlu1 %v425_v19 }
  0xcb   : > { %v402_v37 = vpop.xlane.xlu0 %401 }
  0xcc   : > { %v412_v40 = vmul.f32 0.00390625, %v402_v37  ;;  %v408_v41 = vpop.xlane.xlu1 %407 }
  0xcd   : > { %v414_v43 = vmul.f32 0.00390625, %v408_v41  ;;  %v959_v41 = vsub.s32 0, %v1620_v34 }
  0xce   : > { %v606_v47 = vrot.slane %v412_v40, %v605_v39 }
  0xcf   : > { %v405_v45 = vpop.xlane.xlu0 %404  ;;  %v618_v50 = vrot.slane %v414_v43, %v617_v42 }
  0xd0   : > { %v413_v48 = vmul.f32 0.00390625, %v405_v45  ;;  %v411_v49 = vpop.xlane.xlu1 %410 }
  0xd1   : > { %v415_v51 = vmul.f32 0.00390625, %v411_v49 }
  0xd2   : > { %v611_v52 = vrot.slane %v413_v48, %v610_v44 }
  0xd3   : > { %v625_v53 = vrot.slane %v415_v51, %v624_v46  ;;  %v418_v54 = vpop.xlane.xlu0 %417 }
  0xd4   : > { %v613_v55 = vsel %vm612_vm5, %v611_v52, %v606_v47  ;;  %v709_v56 = vrot.slane %v418_v54, %v605_v39  ;;  %v421_v57 = vpop.xlane.xlu1 %420 }
  0xd5   : > { %v713_v58 = vrot.slane %v421_v57, %v610_v44  ;;  %v620_v59 = vsel %vm619_vm6, %v618_v50, %v613_v55 }
  0xd6   : > { %v627_v60 = vsel %vm626_vm7, %v625_v53, %v620_v59 }
  0xd7   : > { %v714_v61 = vsel %vm612_vm5, %v713_v58, %v709_v56  ;;  %v424_v62 = vpop.xlane.xlu0 %423  ;;  %1154 = vmatmul.mubr.msk.f32.vlgmr.msra.gmra.mrb[2].mxu0 %vm628_vm8, %v627_v60 }
  0xd8   : > { %v718_v63 = vrot.slane %v424_v62, %v617_v42  ;;  %v427_v1 = vpop.xlane.xlu1 %426  ;;  %1197 = vmatpush3.bf16.msra.mxu0 %v1184_v23  ;;  %1175 = vmatprep.mubr.msk.f32.mxu0 %vm1360_vm0, %v1359_v0 }
  0xd9   : > { %v723_v2 = vrot.slane %v427_v1, %v624_v46  ;;  %1198 = vmatprep.subr.bf16.mxu0 %v1361_v22 }
  0xda   : > { %v719_v3 = vsel %vm619_vm6, %v718_v63, %v714_v61 }
  0xdb   : > { %v724_v7 = vsel %vm626_vm7, %v723_v2, %v719_v3 }
  0xdc   : > { %1200 = vmatpush3.bf16.msra.mxu0 %v1187_v26 }
 0x111   : > { %v514_v28 = vpop.f32.mrb[0].mxu0 }
 0x112   : > { %v515_v29 = vadd.f32 %v514_v28, %v437_v27  ;;  %v1139_v30 = vpop.f32.mrb[1].mxu0 }
 0x114   : > { %v518_v31 = vmax.f32 %v515_v29, 0.0 }
 0x116   : > { %1143 = vmatmul.mubr.msk.f32.vlgmr.msra.gmra.mrb[0].mxu1 %vm519_vm4, %v518_v31 }
 0x117   : > { %1191 = vmatpush3.bf16.msra.mxu1 %v1184_v23  ;;  %1164 = vmatprep.mubr.msk.f32.mxu1 %vm1360_vm0, %v1359_v0 }
 0x118   : > { %1192 = vmatprep.subr.bf16.mxu1 %v1361_v22 }
 0x11b   : > { %1194 = vmatpush3.bf16.msra.mxu1 %v1187_v26  ;;  %v434_v26 = vld [vmem:[%s1717_s4] sm:$0x3] }
 0x11c   : > { %1178 = vmatprep.subr.mxu1 %v1359_v0 }
 0x11e   : > { %1165 = vmatmul.mubr.msk.f32.vlgmr.msra.gmra.mrb[2].mxu1 %vm628_vm8, %v724_v7 }
 0x11f   : > { %1180 = vmatprep.mubr.msk.f32.mxu1 %vm1360_vm0, %v1359_v0  ;;  %1179 = vmatpush3.msk.msra.mxu1 %vm523_vm3, %v434_v26 }
 0x1aa   : > { %v697_v18 = vpop.f32.mrb[2].mxu0 }
 0x1ab   : > { %v1155_v19 = vpop.f32.mrb[3].mxu0  ;;  %v698_v20 = vadd.f32 %v697_v18, %v433_v17 }
 0x1ad   : > { %v701_v22 = vmax.f32 %v698_v20, 0.0 }
 0x1e9   : > { %v593_v14 = vpop.f32.mrb[0].mxu1 }
 0x1ea   : > { %v594_v15 = vadd.f32 %v593_v14, %v439_v11  ;;  %v1144_v16 = vpop.f32.mrb[1].mxu1 }
 0x1ec   : > { %1176 = vmatmul.mubr.msk.f32.vlgmr.msra.gmra.mrb[4].mxu0 %vm628_vm8, %v594_v15 }
 0x1f1   : > { %v793_v21 = vpop.f32.mrb[2].mxu1 }
 0x1f2   : > { %v794_v23 = vadd.f32 %v793_v21, %v433_v17  ;;  %v1166_v0 = vpop.f32.mrb[3].mxu1 }
 0x1f4   : > { %v797_v24 = vmax.f32 %v794_v23, 0.0 }
 0x1f6   : > { %v798_v25 = vadd.f32 %v797_v24, %v701_v22 }
 0x2bf   : > { %v868_v27 = vpop.f32.mrb[4].mxu0 }
 0x2c0   : > { %v869_v28 = vadd.f32 %v868_v27, %v433_v17  ;;  %v1177_v29 = vpop.f32.mrb[5].mxu0 }
 0x2c2   : > { %v872_v30 = vmax.f32 %v869_v28, 0.0 }
 0x2c4   : > { %v873_v31 = vadd.f32 %v872_v30, %v798_v25 }
 0x2c6   : > { %1181 = vmatmul.mubr.msk.f32.vlgmr.msra.gmra.mrb[4].mxu1 %vm519_vm4, %v873_v31 }
 0x399   : > { %v947_v35 = vpop.f32.mrb[4].mxu1 }
 0x39a   : > { %v948_v36 = vadd.f32 %v947_v35, %v874_v33  ;;  %v1182_v37 = vpop.f32.mrb[5].mxu1 }
 0x39c   : > { %v1106_v38 = vmul.f32 -1.442695, %v948_v36 }
 0x39e   : > { %1254 = vpow2.f32 %v1106_v38 }
 0x3a8   : > { %v1255_v39 = vpop.eup %1254 }
 0x3a9   : > { %v954_v40 = vadd.f32 1.0, %v1255_v39 }
 0x3ab   : > { %1256 = vrcp.f32 %v954_v40 }
 0x3b5   : > { %v1257_v42 = vpop.eup %1256 }
 0x3b6   : > { %v960_v43 = vrot.slane %v1257_v42, %v959_v41 }
 0x3b8   : > { %966 = vbcast.lane.b32.xlu1 %v960_v43, 264  ;;  %962 = vbcast.lane.b32.xlu0 %v960_v43, 256 }
 0x3bc   : > { %970 = vbcast.lane.b32.xlu1 %v960_v43, 272 }
 0x3c0   : > { %974 = vbcast.lane.b32.xlu1 %v960_v43, 280 }
 0x42a   : > { %v967_v44 = vpop.permute.xlu1 %966  ;;  %v963_v45 = vpop.permute.xlu0 %962 }
 0x42b   : > { %v978_v46 = vmul.f32 %v967_v44, %v1571_v9  ;;  %v979_v47 = vmul.f32 %v967_v44, %v1574_v10  ;;  %v976_v48 = vmul.f32 %v963_v45, %v1557_v4  ;;  %v977_v49 = vmul.f32 %v963_v45, %v1560_v5 }
 0x42d   : > { %986 = vst [vmem:[%s388_s30 + $0x10] sm:$0xff] %v978_v46  ;;  %987 = vst [vmem:[%s388_s30 + $0x18] sm:$0xff] %v979_v47 }
 0x42e   : > { %984 = vst [vmem:[%s388_s30] sm:$0xff] %v976_v48  ;;  %985 = vst [vmem:[%s388_s30 + $0x8] sm:$0xff] %v977_v49  ;;  %v971_v34 = vpop.permute.xlu1 %970 }
 0x42f   : > { %v980_v50 = vmul.f32 %v971_v34, %v1563_v6  ;;  %v981_v9 = vmul.f32 %v971_v34, %v1568_v8 }
 0x431   : > { %988 = vst [vmem:[%s388_s30 + $0x20] sm:$0xff] %v980_v50  ;;  %989 = vst [vmem:[%s388_s30 + $0x28] sm:$0xff] %v981_v9 }
 0x432   : > { %v975_v4 = vpop.permute.xlu1 %974 }
 0x433   : > { %v982_v5 = vmul.f32 %v975_v4, %v1579_v12  ;;  %v983_v6 = vmul.f32 %v975_v4, %v1582_v13 }
 0x435   : > { %990 = vst [vmem:[%s388_s30 + $0x30] sm:$0xff] %v982_v5  ;;  %991 = vst [vmem:[%s388_s30 + $0x38] sm:$0xff] %v983_v6 }
 0x436   : > { %1301 = shalt.err (!%p1298_p4)
}
 0x437   : > { %s1302_s11 = scalar_lea.hbm %s1667_s22, 1024  ;;  %s1306_s27 = scalar_lea.hbm %s1723_s10, 2048 }
 0x438   : > { %p1303_p5 = scmp.ne.s32.totalorder %s1667_s22, %s1302_s11  ;;  %p1307_p1 = scmp.lt.u32.totalorder %s1667_s22, %s1723_s10 }
 0x439   : > { %p1308_p3 = scmp.lt.u32.totalorder %s1306_s27, %s1302_s11  ;;  %p1310_p6 = scmp.lt.u32.totalorder %s1302_s11, %s1667_s22 }
 0x43a   : > { %p1304_p7 = pnand %p1303_p5, %p1731_p12 }
 0x43b   : > { %p1309_p11 = por %p1308_p3, %p1307_p1 }
 0x43c   : > { %p1305_p9 = pneg %p1304_p7 }
 0x43d   : > { %p1311_p13 = por %p1310_p6, %p1309_p11 }
 0x43f   : > { %p1312_p8 = pnand %p1311_p13, %p1305_p9 }
 0x441   : > { %1315 = shalt.err (!%p1312_p8)
}
 0x442   : > { %s1363_s24 = smov 256   ;;  %s1364_s20 = smov 16  }
 0x443   : > { %1203 = dma.vmem_to_hbm [thread:$0]  (%p1731_p12), %s1662_s29, 1024, %s1667_s22, %s993_s17, %s1363_s24, %s1363_s24, %s1364_s20  }
 0x444 PF: > { %s1021_s21 = sand.u32 1, %s1342_s13   ;;  %p1732_p10 = scmp.ne.s32.totalorder %s1729_s26, 0 }
 0x445   : > { %p1733_p0 = scmp.ge.s32.totalorder %s1354_s16, 2  ;;  %s1022_s11 = scalar_lea.sflag [#allocation4], %s1021_s21 }
 0x447   : > { %p1210_p2 = pnand %p1733_p0, %p1732_p10 }
 0x449   : > { %1337 = dma.done.wait (!%p1210_p2), %s1022_s11, 1024  }
 0x44a   : > { %1339 = vsyncadd (!%p1210_p2), %s1022_s11, 4294966272  ;;  %s1734_s30 = sld [smem:[#allocation8_spill]]  ;;  %p23_p4 = scmp.ge.s32.totalorder %s1445_s19, 4  }
 0x44b   : > { %s1735_s13 = smov %s1346_s14  ;;  %s1736_s14 = smov %s1350_s15 }
 0x44c   : > { %s1738_s16 = smov %s1445_s19  ;;  %25 = sbr.rel (!%p23_p4) target bundleno = 5 (0x5), region = 108 }
 0x450   : > { %s1737_s15 = smov %s1734_s30 }
 0x453   :  { %1027 = vsyncpa [#allocation3], 1 }
 0x454   :  { %1029 = vsyncpa [#allocation3 + $0x1], 1 }
 0x455   :  { %1030 = vsyncpa [#allocation4], 1 }
 0x456   :  { %1032 = vsyncpa [#allocation4 + $0x1], 1 }

</bundles_post_ra>
